<compile_context>
chip_gen: v7x
topology: tpu7x:2x2x1
jax: 0.10.0
libtpu: 0.0.40
codegen_flags: <defaults>
</compile_context>

<pallas_src>
import jax
import jax.numpy as jnp
from jax.experimental import pallas as pl
from jax.experimental.pallas import tpu as pltpu


# ----------------------------- glue (plain JAX) -----------------------------

def get_overlap_inputs(x, overlap_size):
    """x: (B, T, F) -> (B, T, F * overlap_size); matches torch.roll + zero-fill."""
    outs = []
    for rep in range(overlap_size):
        shifted = jnp.roll(x, rep, axis=1)
        if rep > 0:
            shifted = shifted.at[:, :rep, :].set(0.0)
        outs.append(shifted)
    return jnp.concatenate(outs, axis=2)


def add_position_encode(x, pos_emb):
    """x: (B, T, D), pos_emb: (T, 4) -> (B, T, D + 4)."""
    B = x.shape[0]
    pe = jnp.broadcast_to(pos_emb[None, :, :], (B,) + pos_emb.shape)
    return jnp.concatenate([x, pe], axis=-1)


# ----------------------------- Pallas GRU kernel ----------------------------

def gru_seq_kernel(gx_ref, w_h_ref, b_hn_ref, out_ref):
    """Single-invocation GRU recurrence.

    gx_ref  : (T, B, 3H) precomputed input-side gates (x @ W_i + folded biases)
    w_h_ref : (H, 3H)    fused recurrent weights [W_hr | W_hz | W_hn]
    b_hn_ref: (1, H)     recurrent bias of the candidate gate (inside r*(...))
    out_ref : (T, B, H)  per-timestep hidden states
    """
    T, B, _ = gx_ref.shape
    H = out_ref.shape[-1]

    # Weights / bias loaded once, held in vregs for the whole unrolled loop.
    w_h = w_h_ref[...]        # (H, 3H)
    b_hn = b_hn_ref[...]      # (1, H)

    h = jnp.zeros((B, H), jnp.float32)
    # T is a compile-time constant (T=8): fully unrolled serial recurrence.
    for t in range(T):
        gx = gx_ref[t]                                               # (B, 3H)
        hw = jnp.dot(h, w_h, preferred_element_type=jnp.float32)     # one MXU dot/step
        # Fused r|z sigmoid on a single (B, 2H) slab.
        rz = jax.nn.sigmoid(gx[:, :2 * H] + hw[:, :2 * H])
        r = rz[:, :H]
        z = rz[:, H:]
        # PyTorch GRU: n = tanh(i_n + b_in + r * (h @ W_hn^T + b_hn))
        n = jnp.tanh(gx[:, 2 * H:] + r * (hw[:, 2 * H:] + b_hn))
        h = (1.0 - z) * n + z * h
        out_ref[t] = h.astype(out_ref.dtype)
    # The full (T, B, H) slab is written back to HBM once when the kernel ends.


def gru_forward(encode_tm, w_i, w_h, b_x, b_hn, hidden_size):
    """encode_tm: (T, B, D) time-major input. Returns out: (T, B, H)."""
    T, B, D = encode_tm.shape
    H = hidden_size

    # Hoisted, time-batched input projection (off the serial critical path).
    # NOTE: on v6e/v7x this matmul could run in bf16 (f32 accumulate) for MXU
    # peak; kept f32 here for exact parity at these tiny sizes.
    gates_x = jnp.einsum('tbd,dg->tbg', encode_tm, w_i) + b_x        # (T, B, 3H)

    return pl.pallas_call(
        gru_seq_kernel,
        out_shape=jax.ShapeDtypeStruct((T, B, H), jnp.float32),
        in_specs=[
            pl.BlockSpec(memory_space=pltpu.MemorySpace.VMEM),
            pl.BlockSpec(memory_space=pltpu.MemorySpace.VMEM),
            pl.BlockSpec(memory_space=pltpu.MemorySpace.VMEM),
        ],
        out_specs=pl.BlockSpec(memory_space=pltpu.MemorySpace.VMEM),
    )(gates_x, w_h, b_hn)


# ------------------------------- Encoder module ------------------------------

class EncoderPallas:
    def __init__(self, num_features, num_timesteps_input, hidden_size,
                 overlap_size, use_pos_encode, key):
        self.num_features = num_features
        self.num_timesteps_input = num_timesteps_input
        self.hidden_size = hidden_size
        self.overlap_size = overlap_size
        self.use_pos_encode = use_pos_encode

        rnn_input_size = num_features * overlap_size + 4 * int(use_pos_encode)
        self.rnn_input_size = rnn_input_size

        keys = jax.random.split(key, 5)
        # nn.Embedding(num_timesteps_input, 4): weights ~ N(0, 1)
        self.pos_emb = jax.random.normal(keys[0], (num_timesteps_input, 4),
                                         dtype=jnp.float32)

        # nn.GRU(rnn_input_size, hidden_size): uniform(-1/sqrt(H), 1/sqrt(H))
        k = 1.0 / jnp.sqrt(jnp.float32(hidden_size))
        H, D = hidden_size, rnn_input_size
        w_ih = jax.random.uniform(keys[1], (3 * H, D), jnp.float32, -k, k)
        w_hh = jax.random.uniform(keys[2], (3 * H, H), jnp.float32, -k, k)
        b_ih = jax.random.uniform(keys[3], (3 * H,), jnp.float32, -k, k)
        b_hh = jax.random.uniform(keys[4], (3 * H,), jnp.float32, -k, k)

        # Fused packing (PyTorch gate order r, z, n along the 3H axis):
        #   x @ w_i -> [i_r | i_z | i_n],  h @ w_h -> [h_r | h_z | h_n]
        self.w_i = w_ih.T                                   # (D, 3H)
        self.w_h = w_hh.T                                   # (H, 3H)
        # Pre-fold biases: r/z gates take b_i + b_h (both outside r*(...));
        # the candidate gate keeps b_in on the input side, b_hn separately.
        b_x = jnp.concatenate([b_ih[:H] + b_hh[:H],
                               b_ih[H:2 * H] + b_hh[H:2 * H],
                               b_ih[2 * H:]])               # (3H,)
        self.b_x = b_x.reshape(1, 1, 3 * H)
        self.b_hn = b_hh[2 * H:].reshape(1, H)

    def __call__(self, inputs):
        """inputs: (B, T, F) float32 — matches the effective torch forward."""
        B, T, F = inputs.shape
        assert T == self.num_timesteps_input and F == self.num_features

        overlap = get_overlap_inputs(inputs, self.overlap_size)    # (B, T, F*ov)
        if self.use_pos_encode:
            encode_inputs = add_position_encode(overlap, self.pos_emb)
        else:
            encode_inputs = overlap

        # permute(1, 0, 2): time-major
        overlap_tm = jnp.transpose(overlap, (1, 0, 2))              # (T, B, F*ov)
        encode_tm = jnp.transpose(encode_inputs, (1, 0, 2))         # (T, B, D_in)

        out = gru_forward(encode_tm, self.w_i, self.w_h, self.b_x,
                          self.b_hn, self.hidden_size)              # (T, B, H)
        hidden = out[-1][None]                                      # (1, B, H)

        # last = inputs.view(T, B, overlap, F)[-1, :, :, 0]  -> (B, overlap)
        last = overlap_tm.reshape(T, B, self.overlap_size,
                                  self.num_features)[-1, :, :, 0]
        last = jax.lax.stop_gradient(last)
        return out, hidden, last


# ----------------------------------- main ------------------------------------

if __name__ == "__main__":
    key = jax.random.PRNGKey(0)
    k_param, k_data = jax.random.split(key)

    batch = 2
    num_timesteps = 8
    num_features = 4
    hidden_size = 32
    overlap_size = 3
    use_pos_encode = True

    enc = EncoderPallas(num_features, num_timesteps, hidden_size,
                        overlap_size, use_pos_encode, k_param)

    x = jax.random.normal(k_data, (batch, num_timesteps, num_features),
                          dtype=jnp.float32)

    out, hidden, last = enc(x)
    jax.block_until_ready((out, hidden, last))

    assert out.shape == (num_timesteps, batch, hidden_size)
    assert hidden.shape == (1, batch, hidden_size)
    assert last.shape == (batch, overlap_size)

    print("KERNEL_OK")
</pallas_src>

<mosaic_0001>
module attributes {stable_mosaic.version = 11 : i64} {
  func.func @gru_seq_kernel(%arg0: memref<8x2x96xf32, #tpu.memory_space<vmem>>, %arg1: memref<32x96xf32, #tpu.memory_space<vmem>>, %arg2: memref<1x32xf32, #tpu.memory_space<vmem>>, %arg3: memref<8x2x32xf32, #tpu.memory_space<vmem>>) attributes {dimension_semantics = [], scalar_prefetch = 0 : i64, scratch_operands = 0 : i64, tpu.core_type = #tpu.core_type<tc>} {
    %c0 = arith.constant 0 : index
    %c0_0 = arith.constant 0 : index
    %0 = vector.load %arg1[%c0, %c0_0] : memref<32x96xf32, #tpu.memory_space<vmem>>, vector<32x96xf32>
    %c0_1 = arith.constant 0 : index
    %c0_2 = arith.constant 0 : index
    %1 = vector.load %arg2[%c0_1, %c0_2] : memref<1x32xf32, #tpu.memory_space<vmem>>, vector<1x32xf32>
    %cst = arith.constant 0.000000e+00 : f32
    %2 = vector.broadcast %cst : f32 to vector<2x32xf32>
    %c0_3 = arith.constant 0 : index
    %c0_4 = arith.constant 0 : index
    %c0_5 = arith.constant 0 : index
    %3 = vector.load %arg0[%c0_3, %c0_4, %c0_5] : memref<8x2x96xf32, #tpu.memory_space<vmem>>, vector<1x2x96xf32>
    %4 = vector.shape_cast %3 : vector<1x2x96xf32> to vector<2x96xf32>
    %cst_6 = arith.constant dense<0.000000e+00> : vector<2x96xf32>
    %5 = tpu.matmul %2, %0, %cst_6 {dimension_numbers = #tpu.dot_dimension_numbers<[1], [0], [0], [1], [0, 0, 1, 1], [], []>} : vector<2x32xf32>, vector<32x96xf32>, vector<2x96xf32> -> vector<2x96xf32>
    %6 = vector.extract_strided_slice %4 {offsets = [0, 0], sizes = [2, 64], strides = [1, 1]} : vector<2x96xf32> to vector<2x64xf32>
    %7 = vector.extract_strided_slice %5 {offsets = [0, 0], sizes = [2, 64], strides = [1, 1]} : vector<2x96xf32> to vector<2x64xf32>
    %8 = arith.addf %6, %7 : vector<2x64xf32>
    %9 = arith.negf %8 : vector<2x64xf32>
    %10 = math.exp %9 : vector<2x64xf32>
    %cst_7 = arith.constant 1.000000e+00 : f32
    %11 = vector.broadcast %cst_7 : f32 to vector<2x64xf32>
    %12 = arith.addf %11, %10 : vector<2x64xf32>
    %13 = arith.divf %11, %12 : vector<2x64xf32>
    %14 = vector.extract_strided_slice %13 {offsets = [0, 0], sizes = [2, 32], strides = [1, 1]} : vector<2x64xf32> to vector<2x32xf32>
    %15 = vector.extract_strided_slice %13 {offsets = [0, 32], sizes = [2, 32], strides = [1, 1]} : vector<2x64xf32> to vector<2x32xf32>
    %16 = vector.extract_strided_slice %4 {offsets = [0, 64], sizes = [2, 32], strides = [1, 1]} : vector<2x96xf32> to vector<2x32xf32>
    %17 = vector.extract_strided_slice %5 {offsets = [0, 64], sizes = [2, 32], strides = [1, 1]} : vector<2x96xf32> to vector<2x32xf32>
    %18 = vector.broadcast %1 : vector<1x32xf32> to vector<2x32xf32>
    %19 = arith.addf %17, %18 : vector<2x32xf32>
    %20 = arith.mulf %14, %19 : vector<2x32xf32>
    %21 = arith.addf %16, %20 : vector<2x32xf32>
    %22 = math.tanh %21 : vector<2x32xf32>
    %cst_8 = arith.constant 1.000000e+00 : f32
    %23 = vector.broadcast %cst_8 : f32 to vector<2x32xf32>
    %24 = arith.subf %23, %15 : vector<2x32xf32>
    %25 = arith.mulf %24, %22 : vector<2x32xf32>
    %26 = arith.mulf %15, %2 : vector<2x32xf32>
    %27 = arith.addf %25, %26 : vector<2x32xf32>
    %c0_9 = arith.constant 0 : index
    %c0_10 = arith.constant 0 : index
    %c0_11 = arith.constant 0 : index
    %28 = vector.load %arg3[%c0_9, %c0_10, %c0_11] : memref<8x2x32xf32, #tpu.memory_space<vmem>>, vector<1x2x32xf32>
    %29 = vector.shape_cast %28 : vector<1x2x32xf32> to vector<2x32xf32>
    %30 = vector.shape_cast %27 : vector<2x32xf32> to vector<1x2x32xf32>
    tpu.vector_store %arg3[%c0_9, %c0_10, %c0_11], %30 {strides = array<i32>} : memref<8x2x32xf32, #tpu.memory_space<vmem>>, vector<1x2x32xf32>,
    %c1 = arith.constant 1 : index
    %c0_12 = arith.constant 0 : index
    %c0_13 = arith.constant 0 : index
    %31 = vector.load %arg0[%c1, %c0_12, %c0_13] : memref<8x2x96xf32, #tpu.memory_space<vmem>>, vector<1x2x96xf32>
    %32 = vector.shape_cast %31 : vector<1x2x96xf32> to vector<2x96xf32>
    %cst_14 = arith.constant dense<0.000000e+00> : vector<2x96xf32>
    %33 = tpu.matmul %27, %0, %cst_14 {dimension_numbers = #tpu.dot_dimension_numbers<[1], [0], [0], [1], [0, 0, 1, 1], [], []>} : vector<2x32xf32>, vector<32x96xf32>, vector<2x96xf32> -> vector<2x96xf32>
    %34 = vector.extract_strided_slice %32 {offsets = [0, 0], sizes = [2, 64], strides = [1, 1]} : vector<2x96xf32> to vector<2x64xf32>
    %35 = vector.extract_strided_slice %33 {offsets = [0, 0], sizes = [2, 64], strides = [1, 1]} : vector<2x96xf32> to vector<2x64xf32>
    %36 = arith.addf %34, %35 : vector<2x64xf32>
    %37 = arith.negf %36 : vector<2x64xf32>
    %38 = math.exp %37 : vector<2x64xf32>
    %cst_15 = arith.constant 1.000000e+00 : f32
    %39 = vector.broadcast %cst_15 : f32 to vector<2x64xf32>
    %40 = arith.addf %39, %38 : vector<2x64xf32>
    %41 = arith.divf %39, %40 : vector<2x64xf32>
    %42 = vector.extract_strided_slice %41 {offsets = [0, 0], sizes = [2, 32], strides = [1, 1]} : vector<2x64xf32> to vector<2x32xf32>
    %43 = vector.extract_strided_slice %41 {offsets = [0, 32], sizes = [2, 32], strides = [1, 1]} : vector<2x64xf32> to vector<2x32xf32>
    %44 = vector.extract_strided_slice %32 {offsets = [0, 64], sizes = [2, 32], strides = [1, 1]} : vector<2x96xf32> to vector<2x32xf32>
    %45 = vector.extract_strided_slice %33 {offsets = [0, 64], sizes = [2, 32], strides = [1, 1]} : vector<2x96xf32> to vector<2x32xf32>
    %46 = vector.broadcast %1 : vector<1x32xf32> to vector<2x32xf32>
    %47 = arith.addf %45, %46 : vector<2x32xf32>
    %48 = arith.mulf %42, %47 : vector<2x32xf32>
    %49 = arith.addf %44, %48 : vector<2x32xf32>
    %50 = math.tanh %49 : vector<2x32xf32>
    %cst_16 = arith.constant 1.000000e+00 : f32
    %51 = vector.broadcast %cst_16 : f32 to vector<2x32xf32>
    %52 = arith.subf %51, %43 : vector<2x32xf32>
    %53 = arith.mulf %52, %50 : vector<2x32xf32>
    %54 = arith.mulf %43, %27 : vector<2x32xf32>
    %55 = arith.addf %53, %54 : vector<2x32xf32>
    %c1_17 = arith.constant 1 : index
    %c0_18 = arith.constant 0 : index
    %c0_19 = arith.constant 0 : index
    %56 = vector.load %arg3[%c1_17, %c0_18, %c0_19] : memref<8x2x32xf32, #tpu.memory_space<vmem>>, vector<1x2x32xf32>
    %57 = vector.shape_cast %56 : vector<1x2x32xf32> to vector<2x32xf32>
    %58 = vector.shape_cast %55 : vector<2x32xf32> to vector<1x2x32xf32>
    tpu.vector_store %arg3[%c1_17, %c0_18, %c0_19], %58 {strides = array<i32>} : memref<8x2x32xf32, #tpu.memory_space<vmem>>, vector<1x2x32xf32>,
    %c2 = arith.constant 2 : index
    %c0_20 = arith.constant 0 : index
    %c0_21 = arith.constant 0 : index
    %59 = vector.load %arg0[%c2, %c0_20, %c0_21] : memref<8x2x96xf32, #tpu.memory_space<vmem>>, vector<1x2x96xf32>
    %60 = vector.shape_cast %59 : vector<1x2x96xf32> to vector<2x96xf32>
    %cst_22 = arith.constant dense<0.000000e+00> : vector<2x96xf32>
    %61 = tpu.matmul %55, %0, %cst_22 {dimension_numbers = #tpu.dot_dimension_numbers<[1], [0], [0], [1], [0, 0, 1, 1], [], []>} : vector<2x32xf32>, vector<32x96xf32>, vector<2x96xf32> -> vector<2x96xf32>
    %62 = vector.extract_strided_slice %60 {offsets = [0, 0], sizes = [2, 64], strides = [1, 1]} : vector<2x96xf32> to vector<2x64xf32>
    %63 = vector.extract_strided_slice %61 {offsets = [0, 0], sizes = [2, 64], strides = [1, 1]} : vector<2x96xf32> to vector<2x64xf32>
    %64 = arith.addf %62, %63 : vector<2x64xf32>
    %65 = arith.negf %64 : vector<2x64xf32>
    %66 = math.exp %65 : vector<2x64xf32>
    %cst_23 = arith.constant 1.000000e+00 : f32
    %67 = vector.broadcast %cst_23 : f32 to vector<2x64xf32>
    %68 = arith.addf %67, %66 : vector<2x64xf32>
    %69 = arith.divf %67, %68 : vector<2x64xf32>
    %70 = vector.extract_strided_slice %69 {offsets = [0, 0], sizes = [2, 32], strides = [1, 1]} : vector<2x64xf32> to vector<2x32xf32>
    %71 = vector.extract_strided_slice %69 {offsets = [0, 32], sizes = [2, 32], strides = [1, 1]} : vector<2x64xf32> to vector<2x32xf32>
    %72 = vector.extract_strided_slice %60 {offsets = [0, 64], sizes = [2, 32], strides = [1, 1]} : vector<2x96xf32> to vector<2x32xf32>
    %73 = vector.extract_strided_slice %61 {offsets = [0, 64], sizes = [2, 32], strides = [1, 1]} : vector<2x96xf32> to vector<2x32xf32>
    %74 = vector.broadcast %1 : vector<1x32xf32> to vector<2x32xf32>
    %75 = arith.addf %73, %74 : vector<2x32xf32>
    %76 = arith.mulf %70, %75 : vector<2x32xf32>
    %77 = arith.addf %72, %76 : vector<2x32xf32>
    %78 = math.tanh %77 : vector<2x32xf32>
    %cst_24 = arith.constant 1.000000e+00 : f32
    %79 = vector.broadcast %cst_24 : f32 to vector<2x32xf32>
    %80 = arith.subf %79, %71 : vector<2x32xf32>
    %81 = arith.mulf %80, %78 : vector<2x32xf32>
    %82 = arith.mulf %71, %55 : vector<2x32xf32>
    %83 = arith.addf %81, %82 : vector<2x32xf32>
    %c2_25 = arith.constant 2 : index
    %c0_26 = arith.constant 0 : index
    %c0_27 = arith.constant 0 : index
    %84 = vector.load %arg3[%c2_25, %c0_26, %c0_27] : memref<8x2x32xf32, #tpu.memory_space<vmem>>, vector<1x2x32xf32>
    %85 = vector.shape_cast %84 : vector<1x2x32xf32> to vector<2x32xf32>
    %86 = vector.shape_cast %83 : vector<2x32xf32> to vector<1x2x32xf32>
    tpu.vector_store %arg3[%c2_25, %c0_26, %c0_27], %86 {strides = array<i32>} : memref<8x2x32xf32, #tpu.memory_space<vmem>>, vector<1x2x32xf32>,
    %c3 = arith.constant 3 : index
    %c0_28 = arith.constant 0 : index
    %c0_29 = arith.constant 0 : index
    %87 = vector.load %arg0[%c3, %c0_28, %c0_29] : memref<8x2x96xf32, #tpu.memory_space<vmem>>, vector<1x2x96xf32>
    %88 = vector.shape_cast %87 : vector<1x2x96xf32> to vector<2x96xf32>
    %cst_30 = arith.constant dense<0.000000e+00> : vector<2x96xf32>
    %89 = tpu.matmul %83, %0, %cst_30 {dimension_numbers = #tpu.dot_dimension_numbers<[1], [0], [0], [1], [0, 0, 1, 1], [], []>} : vector<2x32xf32>, vector<32x96xf32>, vector<2x96xf32> -> vector<2x96xf32>
    %90 = vector.extract_strided_slice %88 {offsets = [0, 0], sizes = [2, 64], strides = [1, 1]} : vector<2x96xf32> to vector<2x64xf32>
    %91 = vector.extract_strided_slice %89 {offsets = [0, 0], sizes = [2, 64], strides = [1, 1]} : vector<2x96xf32> to vector<2x64xf32>
    %92 = arith.addf %90, %91 : vector<2x64xf32>
    %93 = arith.negf %92 : vector<2x64xf32>
    %94 = math.exp %93 : vector<2x64xf32>
    %cst_31 = arith.constant 1.000000e+00 : f32
    %95 = vector.broadcast %cst_31 : f32 to vector<2x64xf32>
    %96 = arith.addf %95, %94 : vector<2x64xf32>
    %97 = arith.divf %95, %96 : vector<2x64xf32>
    %98 = vector.extract_strided_slice %97 {offsets = [0, 0], sizes = [2, 32], strides = [1, 1]} : vector<2x64xf32> to vector<2x32xf32>
    %99 = vector.extract_strided_slice %97 {offsets = [0, 32], sizes = [2, 32], strides = [1, 1]} : vector<2x64xf32> to vector<2x32xf32>
    %100 = vector.extract_strided_slice %88 {offsets = [0, 64], sizes = [2, 32], strides = [1, 1]} : vector<2x96xf32> to vector<2x32xf32>
    %101 = vector.extract_strided_slice %89 {offsets = [0, 64], sizes = [2, 32], strides = [1, 1]} : vector<2x96xf32> to vector<2x32xf32>
    %102 = vector.broadcast %1 : vector<1x32xf32> to vector<2x32xf32>
    %103 = arith.addf %101, %102 : vector<2x32xf32>
    %104 = arith.mulf %98, %103 : vector<2x32xf32>
    %105 = arith.addf %100, %104 : vector<2x32xf32>
    %106 = math.tanh %105 : vector<2x32xf32>
    %cst_32 = arith.constant 1.000000e+00 : f32
    %107 = vector.broadcast %cst_32 : f32 to vector<2x32xf32>
    %108 = arith.subf %107, %99 : vector<2x32xf32>
    %109 = arith.mulf %108, %106 : vector<2x32xf32>
    %110 = arith.mulf %99, %83 : vector<2x32xf32>
    %111 = arith.addf %109, %110 : vector<2x32xf32>
    %c3_33 = arith.constant 3 : index
    %c0_34 = arith.constant 0 : index
    %c0_35 = arith.constant 0 : index
    %112 = vector.load %arg3[%c3_33, %c0_34, %c0_35] : memref<8x2x32xf32, #tpu.memory_space<vmem>>, vector<1x2x32xf32>
    %113 = vector.shape_cast %112 : vector<1x2x32xf32> to vector<2x32xf32>
    %114 = vector.shape_cast %111 : vector<2x32xf32> to vector<1x2x32xf32>
    tpu.vector_store %arg3[%c3_33, %c0_34, %c0_35], %114 {strides = array<i32>} : memref<8x2x32xf32, #tpu.memory_space<vmem>>, vector<1x2x32xf32>,
    %c4 = arith.constant 4 : index
    %c0_36 = arith.constant 0 : index
    %c0_37 = arith.constant 0 : index
    %115 = vector.load %arg0[%c4, %c0_36, %c0_37] : memref<8x2x96xf32, #tpu.memory_space<vmem>>, vector<1x2x96xf32>
    %116 = vector.shape_cast %115 : vector<1x2x96xf32> to vector<2x96xf32>
    %cst_38 = arith.constant dense<0.000000e+00> : vector<2x96xf32>
    %117 = tpu.matmul %111, %0, %cst_38 {dimension_numbers = #tpu.dot_dimension_numbers<[1], [0], [0], [1], [0, 0, 1, 1], [], []>} : vector<2x32xf32>, vector<32x96xf32>, vector<2x96xf32> -> vector<2x96xf32>
    %118 = vector.extract_strided_slice %116 {offsets = [0, 0], sizes = [2, 64], strides = [1, 1]} : vector<2x96xf32> to vector<2x64xf32>
    %119 = vector.extract_strided_slice %117 {offsets = [0, 0], sizes = [2, 64], strides = [1, 1]} : vector<2x96xf32> to vector<2x64xf32>
    %120 = arith.addf %118, %119 : vector<2x64xf32>
    %121 = arith.negf %120 : vector<2x64xf32>
    %122 = math.exp %121 : vector<2x64xf32>
    %cst_39 = arith.constant 1.000000e+00 : f32
    %123 = vector.broadcast %cst_39 : f32 to vector<2x64xf32>
    %124 = arith.addf %123, %122 : vector<2x64xf32>
    %125 = arith.divf %123, %124 : vector<2x64xf32>
    %126 = vector.extract_strided_slice %125 {offsets = [0, 0], sizes = [2, 32], strides = [1, 1]} : vector<2x64xf32> to vector<2x32xf32>
    %127 = vector.extract_strided_slice %125 {offsets = [0, 32], sizes = [2, 32], strides = [1, 1]} : vector<2x64xf32> to vector<2x32xf32>
    %128 = vector.extract_strided_slice %116 {offsets = [0, 64], sizes = [2, 32], strides = [1, 1]} : vector<2x96xf32> to vector<2x32xf32>
    %129 = vector.extract_strided_slice %117 {offsets = [0, 64], sizes = [2, 32], strides = [1, 1]} : vector<2x96xf32> to vector<2x32xf32>
    %130 = vector.broadcast %1 : vector<1x32xf32> to vector<2x32xf32>
    %131 = arith.addf %129, %130 : vector<2x32xf32>
    %132 = arith.mulf %126, %131 : vector<2x32xf32>
    %133 = arith.addf %128, %132 : vector<2x32xf32>
    %134 = math.tanh %133 : vector<2x32xf32>
    %cst_40 = arith.constant 1.000000e+00 : f32
    %135 = vector.broadcast %cst_40 : f32 to vector<2x32xf32>
    %136 = arith.subf %135, %127 : vector<2x32xf32>
    %137 = arith.mulf %136, %134 : vector<2x32xf32>
    %138 = arith.mulf %127, %111 : vector<2x32xf32>
    %139 = arith.addf %137, %138 : vector<2x32xf32>
    %c4_41 = arith.constant 4 : index
    %c0_42 = arith.constant 0 : index
    %c0_43 = arith.constant 0 : index
    %140 = vector.load %arg3[%c4_41, %c0_42, %c0_43] : memref<8x2x32xf32, #tpu.memory_space<vmem>>, vector<1x2x32xf32>
    %141 = vector.shape_cast %140 : vector<1x2x32xf32> to vector<2x32xf32>
    %142 = vector.shape_cast %139 : vector<2x32xf32> to vector<1x2x32xf32>
    tpu.vector_store %arg3[%c4_41, %c0_42, %c0_43], %142 {strides = array<i32>} : memref<8x2x32xf32, #tpu.memory_space<vmem>>, vector<1x2x32xf32>,
    %c5 = arith.constant 5 : index
    %c0_44 = arith.constant 0 : index
    %c0_45 = arith.constant 0 : index
    %143 = vector.load %arg0[%c5, %c0_44, %c0_45] : memref<8x2x96xf32, #tpu.memory_space<vmem>>, vector<1x2x96xf32>
    %144 = vector.shape_cast %143 : vector<1x2x96xf32> to vector<2x96xf32>
    %cst_46 = arith.constant dense<0.000000e+00> : vector<2x96xf32>
    %145 = tpu.matmul %139, %0, %cst_46 {dimension_numbers = #tpu.dot_dimension_numbers<[1], [0], [0], [1], [0, 0, 1, 1], [], []>} : vector<2x32xf32>, vector<32x96xf32>, vector<2x96xf32> -> vector<2x96xf32>
    %146 = vector.extract_strided_slice %144 {offsets = [0, 0], sizes = [2, 64], strides = [1, 1]} : vector<2x96xf32> to vector<2x64xf32>
    %147 = vector.extract_strided_slice %145 {offsets = [0, 0], sizes = [2, 64], strides = [1, 1]} : vector<2x96xf32> to vector<2x64xf32>
    %148 = arith.addf %146, %147 : vector<2x64xf32>
    %149 = arith.negf %148 : vector<2x64xf32>
    %150 = math.exp %149 : vector<2x64xf32>
    %cst_47 = arith.constant 1.000000e+00 : f32
    %151 = vector.broadcast %cst_47 : f32 to vector<2x64xf32>
    %152 = arith.addf %151, %150 : vector<2x64xf32>
    %153 = arith.divf %151, %152 : vector<2x64xf32>
    %154 = vector.extract_strided_slice %153 {offsets = [0, 0], sizes = [2, 32], strides = [1, 1]} : vector<2x64xf32> to vector<2x32xf32>
    %155 = vector.extract_strided_slice %153 {offsets = [0, 32], sizes = [2, 32], strides = [1, 1]} : vector<2x64xf32> to vector<2x32xf32>
    %156 = vector.extract_strided_slice %144 {offsets = [0, 64], sizes = [2, 32], strides = [1, 1]} : vector<2x96xf32> to vector<2x32xf32>
    %157 = vector.extract_strided_slice %145 {offsets = [0, 64], sizes = [2, 32], strides = [1, 1]} : vector<2x96xf32> to vector<2x32xf32>
    %158 = vector.broadcast %1 : vector<1x32xf32> to vector<2x32xf32>
    %159 = arith.addf %157, %158 : vector<2x32xf32>
    %160 = arith.mulf %154, %159 : vector<2x32xf32>
    %161 = arith.addf %156, %160 : vector<2x32xf32>
    %162 = math.tanh %161 : vector<2x32xf32>
    %cst_48 = arith.constant 1.000000e+00 : f32
    %163 = vector.broadcast %cst_48 : f32 to vector<2x32xf32>
    %164 = arith.subf %163, %155 : vector<2x32xf32>
    %165 = arith.mulf %164, %162 : vector<2x32xf32>
    %166 = arith.mulf %155, %139 : vector<2x32xf32>
    %167 = arith.addf %165, %166 : vector<2x32xf32>
    %c5_49 = arith.constant 5 : index
    %c0_50 = arith.constant 0 : index
    %c0_51 = arith.constant 0 : index
    %168 = vector.load %arg3[%c5_49, %c0_50, %c0_51] : memref<8x2x32xf32, #tpu.memory_space<vmem>>, vector<1x2x32xf32>
    %169 = vector.shape_cast %168 : vector<1x2x32xf32> to vector<2x32xf32>
    %170 = vector.shape_cast %167 : vector<2x32xf32> to vector<1x2x32xf32>
    tpu.vector_store %arg3[%c5_49, %c0_50, %c0_51], %170 {strides = array<i32>} : memref<8x2x32xf32, #tpu.memory_space<vmem>>, vector<1x2x32xf32>,
    %c6 = arith.constant 6 : index
    %c0_52 = arith.constant 0 : index
    %c0_53 = arith.constant 0 : index
    %171 = vector.load %arg0[%c6, %c0_52, %c0_53] : memref<8x2x96xf32, #tpu.memory_space<vmem>>, vector<1x2x96xf32>
    %172 = vector.shape_cast %171 : vector<1x2x96xf32> to vector<2x96xf32>
    %cst_54 = arith.constant dense<0.000000e+00> : vector<2x96xf32>
    %173 = tpu.matmul %167, %0, %cst_54 {dimension_numbers = #tpu.dot_dimension_numbers<[1], [0], [0], [1], [0, 0, 1, 1], [], []>} : vector<2x32xf32>, vector<32x96xf32>, vector<2x96xf32> -> vector<2x96xf32>
    %174 = vector.extract_strided_slice %172 {offsets = [0, 0], sizes = [2, 64], strides = [1, 1]} : vector<2x96xf32> to vector<2x64xf32>
    %175 = vector.extract_strided_slice %173 {offsets = [0, 0], sizes = [2, 64], strides = [1, 1]} : vector<2x96xf32> to vector<2x64xf32>
    %176 = arith.addf %174, %175 : vector<2x64xf32>
    %177 = arith.negf %176 : vector<2x64xf32>
    %178 = math.exp %177 : vector<2x64xf32>
    %cst_55 = arith.constant 1.000000e+00 : f32
    %179 = vector.broadcast %cst_55 : f32 to vector<2x64xf32>
    %180 = arith.addf %179, %178 : vector<2x64xf32>
    %181 = arith.divf %179, %180 : vector<2x64xf32>
    %182 = vector.extract_strided_slice %181 {offsets = [0, 0], sizes = [2, 32], strides = [1, 1]} : vector<2x64xf32> to vector<2x32xf32>
    %183 = vector.extract_strided_slice %181 {offsets = [0, 32], sizes = [2, 32], strides = [1, 1]} : vector<2x64xf32> to vector<2x32xf32>
    %184 = vector.extract_strided_slice %172 {offsets = [0, 64], sizes = [2, 32], strides = [1, 1]} : vector<2x96xf32> to vector<2x32xf32>
    %185 = vector.extract_strided_slice %173 {offsets = [0, 64], sizes = [2, 32], strides = [1, 1]} : vector<2x96xf32> to vector<2x32xf32>
    %186 = vector.broadcast %1 : vector<1x32xf32> to vector<2x32xf32>
    %187 = arith.addf %185, %186 : vector<2x32xf32>
    %188 = arith.mulf %182, %187 : vector<2x32xf32>
    %189 = arith.addf %184, %188 : vector<2x32xf32>
    %190 = math.tanh %189 : vector<2x32xf32>
    %cst_56 = arith.constant 1.000000e+00 : f32
    %191 = vector.broadcast %cst_56 : f32 to vector<2x32xf32>
    %192 = arith.subf %191, %183 : vector<2x32xf32>
    %193 = arith.mulf %192, %190 : vector<2x32xf32>
    %194 = arith.mulf %183, %167 : vector<2x32xf32>
    %195 = arith.addf %193, %194 : vector<2x32xf32>
    %c6_57 = arith.constant 6 : index
    %c0_58 = arith.constant 0 : index
    %c0_59 = arith.constant 0 : index
    %196 = vector.load %arg3[%c6_57, %c0_58, %c0_59] : memref<8x2x32xf32, #tpu.memory_space<vmem>>, vector<1x2x32xf32>
    %197 = vector.shape_cast %196 : vector<1x2x32xf32> to vector<2x32xf32>
    %198 = vector.shape_cast %195 : vector<2x32xf32> to vector<1x2x32xf32>
    tpu.vector_store %arg3[%c6_57, %c0_58, %c0_59], %198 {strides = array<i32>} : memref<8x2x32xf32, #tpu.memory_space<vmem>>, vector<1x2x32xf32>,
    %c7 = arith.constant 7 : index
    %c0_60 = arith.constant 0 : index
    %c0_61 = arith.constant 0 : index
    %199 = vector.load %arg0[%c7, %c0_60, %c0_61] : memref<8x2x96xf32, #tpu.memory_space<vmem>>, vector<1x2x96xf32>
    %200 = vector.shape_cast %199 : vector<1x2x96xf32> to vector<2x96xf32>
    %cst_62 = arith.constant dense<0.000000e+00> : vector<2x96xf32>
    %201 = tpu.matmul %195, %0, %cst_62 {dimension_numbers = #tpu.dot_dimension_numbers<[1], [0], [0], [1], [0, 0, 1, 1], [], []>} : vector<2x32xf32>, vector<32x96xf32>, vector<2x96xf32> -> vector<2x96xf32>
    %202 = vector.extract_strided_slice %200 {offsets = [0, 0], sizes = [2, 64], strides = [1, 1]} : vector<2x96xf32> to vector<2x64xf32>
    %203 = vector.extract_strided_slice %201 {offsets = [0, 0], sizes = [2, 64], strides = [1, 1]} : vector<2x96xf32> to vector<2x64xf32>
    %204 = arith.addf %202, %203 : vector<2x64xf32>
    %205 = arith.negf %204 : vector<2x64xf32>
    %206 = math.exp %205 : vector<2x64xf32>
    %cst_63 = arith.constant 1.000000e+00 : f32
    %207 = vector.broadcast %cst_63 : f32 to vector<2x64xf32>
    %208 = arith.addf %207, %206 : vector<2x64xf32>
    %209 = arith.divf %207, %208 : vector<2x64xf32>
    %210 = vector.extract_strided_slice %209 {offsets = [0, 0], sizes = [2, 32], strides = [1, 1]} : vector<2x64xf32> to vector<2x32xf32>
    %211 = vector.extract_strided_slice %209 {offsets = [0, 32], sizes = [2, 32], strides = [1, 1]} : vector<2x64xf32> to vector<2x32xf32>
    %212 = vector.extract_strided_slice %200 {offsets = [0, 64], sizes = [2, 32], strides = [1, 1]} : vector<2x96xf32> to vector<2x32xf32>
    %213 = vector.extract_strided_slice %201 {offsets = [0, 64], sizes = [2, 32], strides = [1, 1]} : vector<2x96xf32> to vector<2x32xf32>
    %214 = vector.broadcast %1 : vector<1x32xf32> to vector<2x32xf32>
    %215 = arith.addf %213, %214 : vector<2x32xf32>
    %216 = arith.mulf %210, %215 : vector<2x32xf32>
    %217 = arith.addf %212, %216 : vector<2x32xf32>
    %218 = math.tanh %217 : vector<2x32xf32>
    %cst_64 = arith.constant 1.000000e+00 : f32
    %219 = vector.broadcast %cst_64 : f32 to vector<2x32xf32>
    %220 = arith.subf %219, %211 : vector<2x32xf32>
    %221 = arith.mulf %220, %218 : vector<2x32xf32>
    %222 = arith.mulf %211, %195 : vector<2x32xf32>
    %223 = arith.addf %221, %222 : vector<2x32xf32>
    %c7_65 = arith.constant 7 : index
    %c0_66 = arith.constant 0 : index
    %c0_67 = arith.constant 0 : index
    %224 = vector.load %arg3[%c7_65, %c0_66, %c0_67] : memref<8x2x32xf32, #tpu.memory_space<vmem>>, vector<1x2x32xf32>
    %225 = vector.shape_cast %224 : vector<1x2x32xf32> to vector<2x32xf32>
    %226 = vector.shape_cast %223 : vector<2x32xf32> to vector<1x2x32xf32>
    tpu.vector_store %arg3[%c7_65, %c0_66, %c0_67], %226 {strides = array<i32>} : memref<8x2x32xf32, #tpu.memory_space<vmem>>, vector<1x2x32xf32>,
    return
  }
}

</mosaic_0001>

<bundles_post_ra>
// kernel: tpu_custom_call.1
= control target key start
LH: loop header
LB: loop body
LE: loop exit
PB: predicated region body
PF: predicated region fallthrough
CT: control target
= control target key end

     0   :  { %8 = vsyncpa [#allocation3], 0  ;;  %s1443_s0 = inlined_call_operand.hbm [shape: f32[8,2,96], index: 0, kind: input, shape index: {}]   ;;  %s1444_s1 = inlined_call_operand.hbm [shape: f32[32,96], index: 1, kind: input, shape index: {}]   ;;  %s1445_s2 = inlined_call_operand.vmem [shape: f32[1,32], index: 2, kind: input, shape index: {}]   ;;  %s1446_s3 = inlined_call_operand.hbm [shape: f32[8,2,32], index: 3, kind: output, shape index: {}]  }
   0x1   :  { %9 = vsyncpa [#allocation6], 0 }
   0x2   :  { %10 = vsyncpa [#allocation4], 0  ;;  %s1255_s12 = smov [#allocation2]   ;;  %s1183_s16 = scalar_lea.hbm %s1443_s0, 256 }
   0x3   :  { %s16_s13 = sshll.u32 %s1255_s12, 4  ;;  %p1184_p0 = scmp.ne.s32.totalorder %s1443_s0, %s1183_s16  ;;  %s17_s13 = int_to_ptr.vmem [resolvable:$true] %s16_s13 }
   0x4   :  { %p1187_p1 = scmp.lt.u32.totalorder %s1183_s16, %s1443_s0 }
   0x6   :  { %p1189_p2 = pnand %p1187_p1, %p1184_p0 }
   0x8   :  { %1192 = shalt.err (!%p1189_p2)
}
   0x9   :  { %s1193_s21 = scalar_lea.vmem %s17_s13, 256  ;;  %p1198_p4 = scmp.lt.s32.totalorder %s17_s13, %s17_s13 }
   0xa   :  { %p1194_p3 = scmp.ne.s32.totalorder %s17_s13, %s1193_s21  ;;  %p1199_p5 = scmp.lt.s32.totalorder %s1193_s21, %s1193_s21 }
   0xc   :  { %p1200_p6 = por %p1199_p5, %p1198_p4 }
   0xe   :  { %p1201_p7 = pnand %p1200_p6, %p1194_p3 }
  0x10   :  { %1204 = shalt.err (!%p1201_p7)
}
  0x11   :  { %s1256_s22 = smov 32   ;;  %s1257_s23 = smov 2  }
  0x12   :  { %22 = dma.hbm_to_vmem [thread:$0]  %s1443_s0, 256, %s17_s13, [#allocation3], %s1256_s22, %s1256_s22, %s1257_s23  }
  0x13   :  { %s1258_s26 = smov [#allocation5]   ;;  %s1205_s30 = scalar_lea.hbm %s1444_s1, 512 }
  0x14   :  { %s28_s27 = sshll.u32 %s1258_s26, 4  ;;  %p1206_p8 = scmp.ne.s32.totalorder %s1444_s1, %s1205_s30  ;;  %s29_s27 = int_to_ptr.vmem [resolvable:$true] %s28_s27 }
  0x15   :  { %p1209_p9 = scmp.lt.u32.totalorder %s1205_s30, %s1444_s1 }
  0x17   :  { %p1211_p10 = pnand %p1209_p9, %p1206_p8 }
  0x19   :  { %1214 = shalt.err (!%p1211_p10)
}
  0x1a   :  { %s1215_s8 = scalar_lea.vmem %s29_s27, 512  ;;  %p1220_p12 = scmp.lt.s32.totalorder %s29_s27, %s29_s27 }
  0x1b   :  { %p1216_p11 = scmp.ne.s32.totalorder %s29_s27, %s1215_s8  ;;  %p1221_p13 = scmp.lt.s32.totalorder %s1215_s8, %s1215_s8 }
  0x1d   :  { %p1222_p0 = por %p1221_p13, %p1220_p12 }
  0x1f   :  { %p1223_p1 = pnand %p1222_p0, %p1216_p11 }
  0x21   :  { %1226 = shalt.err (!%p1223_p1)
}
  0x22   :  { %s1259_s0 = smov 128   ;;  %s1260_s9 = smov 8  }
  0x23   :  { %34 = dma.hbm_to_vmem [thread:$0]  %s1444_s1, 512, %s29_s27, [#allocation6], %s1259_s0, %s1259_s0, %s1260_s9  }
  0x24   :  { %1249 = dma.done.wait [#allocation3], 256  }
  0x25   :  { %1250 = vsyncadd [#allocation3], 4294967040 }
  0x26   :  { %1251 = dma.done.wait [#allocation6], 512  }
  0x27   :  { %1252 = vsyncadd [#allocation6], 4294966784  ;;  %v1261_v0 = vmov 0.0|0.0   ;;  %vm1262_vm0 = vmmov 0   ;;  %v1263_v1 = vmov 0.0   ;;  %v43_v2 = vld [vmem:[#allocation5] sm:$0xff] }
  0x28   :  { %1075 = vmatprep.subr.bf16.mxu0 %v1261_v0  ;;  %995 = vmatprep.mubr.msk.f32.mxu0 %vm1262_vm0, %v1263_v1  ;;  %v44_v3 = vld [vmem:[#allocation5 + $0x8] sm:$0xff]  ;;  %v45_v4 = vld [vmem:[#allocation5 + $0x10] sm:$0xff]  ;;  %v46_v6 = vld [vmem:[#allocation5 + $0x18] sm:$0xff]  ;;  %s1264_s13 = smov 64   ;;  %vm162_vm1 = vcmask 254976   ;;  %vm49_vm2 = vcmask 261120  }
  0x29   :  { %1081 = vmatprep.subr.bf16.mxu1 %v1261_v0  ;;  %1006 = vmatprep.mubr.msk.f32.mxu1 %vm1262_vm0, %v1263_v1  ;;  %v1320_v5 = vpack.c.bf16 %v44_v3, %v43_v2  ;;  %v932_v7 = vld [vmem:[%s1445_s2] ss:$0 sm:$0xff]  ;;  %v1327_v8 = vpack.c.bf16 %v46_v6, %v45_v4  ;;  %s1265_s2 = smov 96   ;;  %v165_v33 = vld [vmem:[#allocation2 + $0x2] sm:$0x3]  ;;  %s1266_s14 = smov [#allocation7]  }
  0x2a   :  { %135 = vrot.lane.b32.xlu0 %v932_v7, %s1264_s13  ;;  %v48_v13 = vld [vmem:[#allocation2] sm:$0x3]  ;;  %v272_v53 = vld [vmem:[#allocation2 + $0x4] sm:$0x3]  ;;  %s918_s15 = sshll.u32 %s1266_s14, 4  ;;  %s919_s15 = int_to_ptr.vmem [resolvable:$true] %s918_s15 }
  0x2b   :  { %1077 = vmatpush3.bf16.msra.mxu0 %v1320_v5  ;;  %1083 = vmatpush3.bf16.msra.mxu1 %v1320_v5  ;;  %s1227_s16 = scalar_lea.vmem %s919_s15, 256  ;;  %p1232_p3 = scmp.lt.s32.totalorder %s919_s15, %s919_s15 }
  0x2c   :  { %1078 = vmatprep.subr.bf16.mxu0 %v1261_v0  ;;  %1084 = vmatprep.subr.bf16.mxu1 %v1261_v0  ;;  %p1228_p2 = scmp.ne.s32.totalorder %s919_s15, %s1227_s16  ;;  %p1233_p4 = scmp.lt.s32.totalorder %s1227_s16, %s1227_s16 }
  0x2e   :  { %p1234_p5 = por %p1233_p4, %p1232_p3 }
  0x2f   :  { %1080 = vmatpush3.bf16.msra.mxu0 %v1327_v8  ;;  %1086 = vmatpush3.bf16.msra.mxu1 %v1327_v8 }
  0x30   :  { %1087 = vmatprep.subr.bf16.mxu0 %v1261_v0  ;;  %1093 = vmatprep.subr.bf16.mxu1 %v1261_v0  ;;  %p1235_p6 = pnand %p1234_p5, %p1228_p2 }
  0x32   :  { %996 = vmatmul.mubr.f32.vlgmr.msra.gmra.mrb[0].mxu0 %v1263_v1 }
  0x33   :  { %1089 = vmatpush3.bf16.msra.mxu0 %v1320_v5  ;;  %1017 = vmatprep.mubr.msk.f32.mxu0 %vm1262_vm0, %v1263_v1 }
  0x34   :  { %1090 = vmatprep.subr.bf16.mxu0 %v1261_v0 }
  0x37   :  { %1092 = vmatpush3.bf16.msra.mxu0 %v1327_v8 }
  0x38   :  { %1099 = vmatprep.subr.bf16.mxu0 %v1261_v0 }
  0x9c   :  { %v1343_v9 = vpop.permute.xlu0 %135 }
 0x105   :  { %v119_v10 = vpop.f32.mrb[0].mxu0 }
 0x106   :  { %v138_v11 = vadd.f32 %v1343_v9, %v119_v10  ;;  %v997_v12 = vpop.f32.mrb[1].mxu0  ;;  %v123_v14 = vadd.f32 %v119_v10, %v48_v13 }
 0x108   :  { %140 = vrot.lane.b32.xlu0 %v138_v11, %s1264_s13  ;;  %v931_v15 = vmul.f32 -1.442695, %v123_v14  ;;  %v379_v14 = vld [vmem:[#allocation2 + $0x6] sm:$0x3] }
 0x10a   :  { %1135 = vpow2.f32 %v931_v15 }
 0x114   :  { %v1136_v16 = vpop.eup %1135 }
 0x115   :  { %v127_v17 = vadd.f32 1.0, %v1136_v16 }
 0x117   :  { %1137 = vrcp.f32 %v127_v17 }
 0x121   :  { %v1138_v18 = vpop.eup %1137 }
 0x122   :  { %v150_v24 = vsub.f32 1.0, %v1138_v18  ;;  %v156_v26 = vmul.f32 0.0, %v1138_v18 }
 0x17a   :  { %v141_v19 = vpop.permute.xlu0 %140 }
 0x17b   :  { %v143_v20 = vmul.f32 %v1138_v18, %v141_v19 }
 0x17d   :  { %145 = vrot.lane.b32.xlu1 %v143_v20, %s1264_s13 }
 0x1ef   :  { %v146_v21 = vpop.permute.xlu1 %145 }
 0x1f0   :  { %v148_v22 = vadd.f32 %v146_v21, %v48_v13 }
 0x1f2   :  { %1139 = vtanh.f32 %v148_v22 }
 0x1fc   :  { %v1140_v23 = vpop.eup %1139 }
 0x1fd   :  { %152 = vrot.lane.b32.xlu1 %v1140_v23, %s1265_s2 }
 0x26f   :  { %v153_v25 = vpop.permute.xlu1 %152 }
 0x270   :  { %v155_v27 = vmul.f32 %v153_v25, %v150_v24 }
 0x272   :  { %v157_v28 = vadd.f32 %v156_v26, %v155_v27 }
 0x274   :  { %159 = vrot.lane.b32.xlu0 %v157_v28, %s1265_s2 }
 0x2e6   :  { %v160_v29 = vpop.permute.xlu0 %159 }
 0x2e7   :  { %163 = vst.msk [vmem:[#allocation7] sm:$0x3] %vm162_vm1, %v160_v29  ;;  %1007 = vmatmul.mubr.msk.f32.vlgmr.msra.gmra.mrb[0].mxu1 %vm49_vm2, %v160_v29 }
 0x2e8   :  { %1095 = vmatpush3.bf16.msra.mxu1 %v1320_v5  ;;  %1028 = vmatprep.mubr.msk.f32.mxu1 %vm1262_vm0, %v1263_v1 }
 0x2e9   :  { %1096 = vmatprep.subr.bf16.mxu1 %v1261_v0 }
 0x2ec   :  { %1098 = vmatpush3.bf16.msra.mxu1 %v1327_v8 }
 0x2ed   :  { %1105 = vmatprep.subr.bf16.mxu1 %v1261_v0 }
 0x3ba   :  { %v234_v30 = vpop.f32.mrb[0].mxu1 }
 0x3bb   :  { %v245_v31 = vadd.f32 %v234_v30, %v1343_v9  ;;  %v1008_v32 = vpop.f32.mrb[1].mxu1  ;;  %v238_v34 = vadd.f32 %v234_v30, %v165_v33 }
 0x3bd   :  { %247 = vrot.lane.b32.xlu1 %v245_v31, %s1264_s13  ;;  %v934_v35 = vmul.f32 -1.442695, %v238_v34  ;;  %v486_v34 = vld [vmem:[#allocation2 + $0x8] sm:$0x3] }
 0x3bf   :  { %1141 = vpow2.f32 %v934_v35 }
 0x3c9   :  { %v1142_v36 = vpop.eup %1141 }
 0x3ca   :  { %v242_v37 = vadd.f32 1.0, %v1142_v36 }
 0x3cc   :  { %1143 = vrcp.f32 %v242_v37 }
 0x3d6   :  { %v1144_v38 = vpop.eup %1143 }
 0x3d7   :  { %v257_v44 = vsub.f32 1.0, %v1144_v38  ;;  %v263_v46 = vmul.f32 %v1144_v38, %v157_v28 }
 0x42f   :  { %v248_v39 = vpop.permute.xlu1 %247 }
 0x430   :  { %v250_v40 = vmul.f32 %v1144_v38, %v248_v39 }
 0x432   :  { %252 = vrot.lane.b32.xlu0 %v250_v40, %s1264_s13 }
 0x4a4   :  { %v253_v41 = vpop.permute.xlu0 %252 }
 0x4a5   :  { %v255_v42 = vadd.f32 %v253_v41, %v165_v33 }
 0x4a7   :  { %1145 = vtanh.f32 %v255_v42 }
 0x4b1   :  { %v1146_v43 = vpop.eup %1145 }
 0x4b2   :  { %259 = vrot.lane.b32.xlu1 %v1146_v43, %s1265_s2 }
 0x524   :  { %v260_v45 = vpop.permute.xlu1 %259 }
 0x525   :  { %v262_v47 = vmul.f32 %v260_v45, %v257_v44 }
 0x527   :  { %v264_v48 = vadd.f32 %v263_v46, %v262_v47 }
 0x529   :  { %266 = vrot.lane.b32.xlu0 %v264_v48, %s1265_s2 }
 0x59b   :  { %v267_v49 = vpop.permute.xlu0 %266 }
 0x59c   :  { %270 = vst.msk [vmem:[#allocation7 + $0x2] sm:$0x3] %vm162_vm1, %v267_v49  ;;  %1018 = vmatmul.mubr.msk.f32.vlgmr.msra.gmra.mrb[2].mxu0 %vm49_vm2, %v267_v49 }
 0x59d   :  { %1101 = vmatpush3.bf16.msra.mxu0 %v1320_v5  ;;  %1039 = vmatprep.mubr.msk.f32.mxu0 %vm1262_vm0, %v1263_v1 }
 0x59e   :  { %1102 = vmatprep.subr.bf16.mxu0 %v1261_v0 }
 0x5a1   :  { %1104 = vmatpush3.bf16.msra.mxu0 %v1327_v8 }
 0x5a2   :  { %1111 = vmatprep.subr.bf16.mxu0 %v1261_v0 }
 0x66f   :  { %v341_v50 = vpop.f32.mrb[2].mxu0 }
 0x670   :  { %v352_v51 = vadd.f32 %v341_v50, %v1343_v9  ;;  %v1019_v52 = vpop.f32.mrb[3].mxu0  ;;  %v345_v54 = vadd.f32 %v341_v50, %v272_v53 }
 0x672   :  { %354 = vrot.lane.b32.xlu1 %v352_v51, %s1264_s13  ;;  %v936_v55 = vmul.f32 -1.442695, %v345_v54  ;;  %v593_v54 = vld [vmem:[#allocation2 + $0xa] sm:$0x3] }
 0x674   :  { %1147 = vpow2.f32 %v936_v55 }
 0x67e   :  { %v1148_v56 = vpop.eup %1147 }
 0x67f   :  { %v349_v57 = vadd.f32 1.0, %v1148_v56 }
 0x681   :  { %1149 = vrcp.f32 %v349_v57 }
 0x68b   :  { %v1150_v58 = vpop.eup %1149 }
 0x68c   :  { %v364_v2 = vsub.f32 1.0, %v1150_v58  ;;  %v370_v4 = vmul.f32 %v1150_v58, %v264_v48 }
 0x6e4   :  { %v355_v59 = vpop.permute.xlu1 %354 }
 0x6e5   :  { %v357_v60 = vmul.f32 %v1150_v58, %v355_v59 }
 0x6e7   :  { %359 = vrot.lane.b32.xlu0 %v357_v60, %s1264_s13 }
 0x759   :  { %v360_v61 = vpop.permute.xlu0 %359 }
 0x75a   :  { %v362_v62 = vadd.f32 %v360_v61, %v272_v53 }
 0x75c   :  { %1151 = vtanh.f32 %v362_v62 }
 0x766   :  { %v1152_v63 = vpop.eup %1151 }
 0x767   :  { %366 = vrot.lane.b32.xlu1 %v1152_v63, %s1265_s2 }
 0x7d9   :  { %v367_v3 = vpop.permute.xlu1 %366 }
 0x7da   :  { %v369_v6 = vmul.f32 %v367_v3, %v364_v2 }
 0x7dc   :  { %v371_v7 = vadd.f32 %v370_v4, %v369_v6 }
 0x7de   :  { %373 = vrot.lane.b32.xlu0 %v371_v7, %s1265_s2 }
 0x850   :  { %v374_v10 = vpop.permute.xlu0 %373 }
 0x851   :  { %377 = vst.msk [vmem:[#allocation7 + $0x4] sm:$0x3] %vm162_vm1, %v374_v10  ;;  %1029 = vmatmul.mubr.msk.f32.vlgmr.msra.gmra.mrb[2].mxu1 %vm49_vm2, %v374_v10 }
 0x852   :  { %1107 = vmatpush3.bf16.msra.mxu1 %v1320_v5  ;;  %1050 = vmatprep.mubr.msk.f32.mxu1 %vm1262_vm0, %v1263_v1 }
 0x853   :  { %1108 = vmatprep.subr.bf16.mxu1 %v1261_v0 }
 0x856   :  { %1110 = vmatpush3.bf16.msra.mxu1 %v1327_v8 }
 0x857   :  { %1117 = vmatprep.subr.bf16.mxu1 %v1261_v0 }
 0x924   :  { %v448_v11 = vpop.f32.mrb[2].mxu1 }
 0x925   :  { %v459_v12 = vadd.f32 %v448_v11, %v1343_v9  ;;  %v1030_v13 = vpop.f32.mrb[3].mxu1  ;;  %v452_v15 = vadd.f32 %v448_v11, %v379_v14  ;;  %v700_v11 = vld [vmem:[#allocation2 + $0xc] sm:$0x3] }
 0x927   :  { %461 = vrot.lane.b32.xlu1 %v459_v12, %s1264_s13  ;;  %v938_v16 = vmul.f32 -1.442695, %v452_v15 }
 0x929   :  { %1153 = vpow2.f32 %v938_v16 }
 0x933   :  { %v1154_v17 = vpop.eup %1153 }
 0x934   :  { %v456_v18 = vadd.f32 1.0, %v1154_v17 }
 0x936   :  { %1155 = vrcp.f32 %v456_v18 }
 0x940   :  { %v1156_v19 = vpop.eup %1155 }
 0x941   :  { %v471_v25 = vsub.f32 1.0, %v1156_v19  ;;  %v477_v27 = vmul.f32 %v1156_v19, %v371_v7 }
 0x999   :  { %v462_v20 = vpop.permute.xlu1 %461 }
 0x99a   :  { %v464_v21 = vmul.f32 %v1156_v19, %v462_v20 }
 0x99c   :  { %466 = vrot.lane.b32.xlu0 %v464_v21, %s1264_s13 }
 0xa0e   :  { %v467_v22 = vpop.permute.xlu0 %466 }
 0xa0f   :  { %v469_v23 = vadd.f32 %v467_v22, %v379_v14 }
 0xa11   :  { %1157 = vtanh.f32 %v469_v23 }
 0xa1b   :  { %v1158_v24 = vpop.eup %1157 }
 0xa1c   :  { %473 = vrot.lane.b32.xlu1 %v1158_v24, %s1265_s2 }
 0xa8e   :  { %v474_v26 = vpop.permute.xlu1 %473 }
 0xa8f   :  { %v476_v28 = vmul.f32 %v474_v26, %v471_v25 }
 0xa91   :  { %v478_v29 = vadd.f32 %v477_v27, %v476_v28 }
 0xa93   :  { %480 = vrot.lane.b32.xlu0 %v478_v29, %s1265_s2 }
 0xb05   :  { %v481_v30 = vpop.permute.xlu0 %480 }
 0xb06   :  { %484 = vst.msk [vmem:[#allocation7 + $0x6] sm:$0x3] %vm162_vm1, %v481_v30  ;;  %1040 = vmatmul.mubr.msk.f32.vlgmr.msra.gmra.mrb[4].mxu0 %vm49_vm2, %v481_v30 }
 0xb07   :  { %1113 = vmatpush3.bf16.msra.mxu0 %v1320_v5  ;;  %1061 = vmatprep.mubr.msk.f32.mxu0 %vm1262_vm0, %v1263_v1 }
 0xb08   :  { %1114 = vmatprep.subr.bf16.mxu0 %v1261_v0 }
 0xb0b   :  { %1116 = vmatpush3.bf16.msra.mxu0 %v1327_v8 }
 0xbd9   :  { %v555_v31 = vpop.f32.mrb[4].mxu0 }
 0xbda   :  { %v566_v32 = vadd.f32 %v555_v31, %v1343_v9  ;;  %v1041_v33 = vpop.f32.mrb[5].mxu0  ;;  %v559_v35 = vadd.f32 %v555_v31, %v486_v34  ;;  %v807_v31 = vld [vmem:[#allocation2 + $0xe] sm:$0x3] }
 0xbdc   :  { %568 = vrot.lane.b32.xlu1 %v566_v32, %s1264_s13  ;;  %v940_v36 = vmul.f32 -1.442695, %v559_v35 }
 0xbde   :  { %1159 = vpow2.f32 %v940_v36 }
 0xbe8   :  { %v1160_v37 = vpop.eup %1159 }
 0xbe9   :  { %v563_v38 = vadd.f32 1.0, %v1160_v37 }
 0xbeb   :  { %1161 = vrcp.f32 %v563_v38 }
 0xbf5   :  { %v1162_v39 = vpop.eup %1161 }
 0xbf6   :  { %v578_v45 = vsub.f32 1.0, %v1162_v39  ;;  %v584_v47 = vmul.f32 %v1162_v39, %v478_v29 }
 0xc4e   :  { %v569_v40 = vpop.permute.xlu1 %568 }
 0xc4f   :  { %v571_v41 = vmul.f32 %v1162_v39, %v569_v40 }
 0xc51   :  { %573 = vrot.lane.b32.xlu0 %v571_v41, %s1264_s13 }
 0xcc3   :  { %v574_v42 = vpop.permute.xlu0 %573 }
 0xcc4   :  { %v576_v43 = vadd.f32 %v574_v42, %v486_v34 }
 0xcc6   :  { %1163 = vtanh.f32 %v576_v43 }
 0xcd0   :  { %v1164_v44 = vpop.eup %1163 }
 0xcd1   :  { %580 = vrot.lane.b32.xlu1 %v1164_v44, %s1265_s2 }
 0xd43   :  { %v581_v46 = vpop.permute.xlu1 %580 }
 0xd44   :  { %v583_v48 = vmul.f32 %v581_v46, %v578_v45 }
 0xd46   :  { %v585_v49 = vadd.f32 %v584_v47, %v583_v48 }
 0xd48   :  { %587 = vrot.lane.b32.xlu0 %v585_v49, %s1265_s2 }
 0xdba   :  { %v588_v50 = vpop.permute.xlu0 %587 }
 0xdbb   :  { %591 = vst.msk [vmem:[#allocation7 + $0x8] sm:$0x3] %vm162_vm1, %v588_v50  ;;  %1051 = vmatmul.mubr.msk.f32.vlgmr.msra.gmra.mrb[4].mxu1 %vm49_vm2, %v588_v50 }
 0xdbc   :  { %1119 = vmatpush3.bf16.msra.mxu1 %v1320_v5  ;;  %1072 = vmatprep.mubr.msk.f32.mxu1 %vm1262_vm0, %v1263_v1 }
 0xdbd   :  { %1120 = vmatprep.subr.bf16.mxu1 %v1261_v0 }
 0xdc0   :  { %1122 = vmatpush3.bf16.msra.mxu1 %v1327_v8 }
 0xe8e   :  { %v662_v51 = vpop.f32.mrb[4].mxu1 }
 0xe8f   :  { %v673_v52 = vadd.f32 %v662_v51, %v1343_v9  ;;  %v1052_v53 = vpop.f32.mrb[5].mxu1  ;;  %v666_v55 = vadd.f32 %v662_v51, %v593_v54 }
 0xe91   :  { %675 = vrot.lane.b32.xlu1 %v673_v52, %s1264_s13  ;;  %v942_v56 = vmul.f32 -1.442695, %v666_v55 }
 0xe93   :  { %1165 = vpow2.f32 %v942_v56 }
 0xe9d   :  { %v1166_v57 = vpop.eup %1165 }
 0xe9e   :  { %v670_v58 = vadd.f32 1.0, %v1166_v57 }
 0xea0   :  { %1167 = vrcp.f32 %v670_v58 }
 0xeaa   :  { %v1168_v5 = vpop.eup %1167 }
 0xeab   :  { %v685_v61 = vsub.f32 1.0, %v1168_v5  ;;  %v691_v63 = vmul.f32 %v1168_v5, %v585_v49 }
 0xf03   :  { %v676_v59 = vpop.permute.xlu1 %675 }
 0xf04   :  { %v678_v1 = vmul.f32 %v1168_v5, %v676_v59 }
 0xf06   :  { %680 = vrot.lane.b32.xlu0 %v678_v1, %s1264_s13 }
 0xf78   :  { %v681_v0 = vpop.permute.xlu0 %680 }
 0xf79   :  { %v683_v8 = vadd.f32 %v681_v0, %v593_v54 }
 0xf7b   :  { %1169 = vtanh.f32 %v683_v8 }
 0xf85   :  { %v1170_v60 = vpop.eup %1169 }
 0xf86   :  { %687 = vrot.lane.b32.xlu1 %v1170_v60, %s1265_s2 }
 0xff8   :  { %v688_v62 = vpop.permute.xlu1 %687 }
 0xff9   :  { %v690_v2 = vmul.f32 %v688_v62, %v685_v61 }
 0xffb   :  { %v692_v3 = vadd.f32 %v691_v63, %v690_v2 }
 0xffd   :  { %694 = vrot.lane.b32.xlu0 %v692_v3, %s1265_s2 }
0x106f   :  { %v695_v4 = vpop.permute.xlu0 %694 }
0x1070   :  { %698 = vst.msk [vmem:[#allocation7 + $0xa] sm:$0x3] %vm162_vm1, %v695_v4  ;;  %1062 = vmatmul.mubr.msk.f32.vlgmr.msra.gmra.mrb[6].mxu0 %vm49_vm2, %v695_v4 }
0x1143   :  { %v769_v6 = vpop.f32.mrb[6].mxu0 }
0x1144   :  { %v780_v7 = vadd.f32 %v769_v6, %v1343_v9  ;;  %v1063_v10 = vpop.f32.mrb[7].mxu0  ;;  %v773_v12 = vadd.f32 %v769_v6, %v700_v11 }
0x1146   :  { %782 = vrot.lane.b32.xlu1 %v780_v7, %s1264_s13  ;;  %v944_v13 = vmul.f32 -1.442695, %v773_v12 }
0x1148   :  { %1171 = vpow2.f32 %v944_v13 }
0x1152   :  { %v1172_v14 = vpop.eup %1171 }
0x1153   :  { %v777_v15 = vadd.f32 1.0, %v1172_v14 }
0x1155   :  { %1173 = vrcp.f32 %v777_v15 }
0x115f   :  { %v1174_v16 = vpop.eup %1173 }
0x1160   :  { %v792_v22 = vsub.f32 1.0, %v1174_v16  ;;  %v798_v24 = vmul.f32 %v1174_v16, %v692_v3 }
0x11b8   :  { %v783_v17 = vpop.permute.xlu1 %782 }
0x11b9   :  { %v785_v18 = vmul.f32 %v1174_v16, %v783_v17 }
0x11bb   :  { %787 = vrot.lane.b32.xlu0 %v785_v18, %s1264_s13 }
0x122d   :  { %v788_v19 = vpop.permute.xlu0 %787 }
0x122e   :  { %v790_v20 = vadd.f32 %v788_v19, %v700_v11 }
0x1230   :  { %1175 = vtanh.f32 %v790_v20 }
0x123a   :  { %v1176_v21 = vpop.eup %1175 }
0x123b   :  { %794 = vrot.lane.b32.xlu1 %v1176_v21, %s1265_s2 }
0x12ad   :  { %v795_v23 = vpop.permute.xlu1 %794 }
0x12ae   :  { %v797_v25 = vmul.f32 %v795_v23, %v792_v22 }
0x12b0   :  { %v799_v26 = vadd.f32 %v798_v24, %v797_v25 }
0x12b2   :  { %801 = vrot.lane.b32.xlu0 %v799_v26, %s1265_s2 }
0x1324   :  { %v802_v27 = vpop.permute.xlu0 %801 }
0x1325   :  { %805 = vst.msk [vmem:[#allocation7 + $0xc] sm:$0x3] %vm162_vm1, %v802_v27  ;;  %1073 = vmatmul.mubr.msk.f32.vlgmr.msra.gmra.mrb[6].mxu1 %vm49_vm2, %v802_v27 }
0x13f8   :  { %v876_v28 = vpop.f32.mrb[6].mxu1 }
0x13f9   :  { %v887_v29 = vadd.f32 %v876_v28, %v1343_v9  ;;  %v1074_v30 = vpop.f32.mrb[7].mxu1  ;;  %v880_v32 = vadd.f32 %v876_v28, %v807_v31 }
0x13fb   :  { %889 = vrot.lane.b32.xlu1 %v887_v29, %s1264_s13  ;;  %v946_v33 = vmul.f32 -1.442695, %v880_v32 }
0x13fd   :  { %1177 = vpow2.f32 %v946_v33 }
0x1407   :  { %v1178_v34 = vpop.eup %1177 }
0x1408   :  { %v884_v35 = vadd.f32 1.0, %v1178_v34 }
0x140a   :  { %1179 = vrcp.f32 %v884_v35 }
0x1414   :  { %v1180_v36 = vpop.eup %1179 }
0x1415   :  { %v899_v9 = vsub.f32 1.0, %v1180_v36  ;;  %v905_v43 = vmul.f32 %v1180_v36, %v799_v26 }
0x146d   :  { %v890_v37 = vpop.permute.xlu1 %889 }
0x146e   :  { %v892_v38 = vmul.f32 %v1180_v36, %v890_v37 }
0x1470   :  { %894 = vrot.lane.b32.xlu0 %v892_v38, %s1264_s13 }
0x14e2   :  { %v895_v39 = vpop.permute.xlu0 %894 }
0x14e3   :  { %v897_v40 = vadd.f32 %v895_v39, %v807_v31 }
0x14e5   :  { %1181 = vtanh.f32 %v897_v40 }
0x14ef   :  { %v1182_v41 = vpop.eup %1181 }
0x14f0   :  { %901 = vrot.lane.b32.xlu1 %v1182_v41, %s1265_s2 }
0x1562   :  { %v902_v42 = vpop.permute.xlu1 %901 }
0x1563   :  { %v904_v44 = vmul.f32 %v902_v42, %v899_v9 }
0x1565   :  { %v906_v45 = vadd.f32 %v905_v43, %v904_v44 }
0x1567   :  { %908 = vrot.lane.b32.xlu0 %v906_v45, %s1265_s2 }
0x15d9   :  { %v909_v46 = vpop.permute.xlu0 %908 }
0x15da   :  { %912 = vst.msk [vmem:[#allocation7 + $0xe] sm:$0x3] %vm162_vm1, %v909_v46 }
0x15db   :  { %1238 = shalt.err (!%p1235_p6)
}
0x15dc   :  { %s1239_s19 = scalar_lea.hbm %s1446_s3, 256 }
0x15dd   :  { %p1240_p7 = scmp.ne.s32.totalorder %s1446_s3, %s1239_s19  ;;  %p1243_p8 = scmp.lt.u32.totalorder %s1239_s19, %s1446_s3 }
0x15df   :  { %p1245_p9 = pnand %p1243_p8, %p1240_p7 }
0x15e1   :  { %1248 = shalt.err (!%p1245_p9)
}
0x15e2   :  { %924 = dma.vmem_to_hbm [thread:$0]  %s919_s15, 256, %s1446_s3, [#allocation4], %s1256_s22, %s1256_s22, %s1257_s23  }
0x15e3   :  { %1253 = dma.done.wait [#allocation4], 256  }
0x15e4   :  { %1254 = vsyncadd [#allocation4], 4294967040 }
0x15e5   :  { %928 = vsyncpa [#allocation3], 1 }
0x15e6   :  { %929 = vsyncpa [#allocation6], 1 }
0x15e7   :  { %930 = vsyncpa [#allocation4], 1 }

</bundles_post_ra>
